<compile_context>
chip_gen: v5e
topology: v5e:2x2
jax: 0.10.0
libtpu: 0.0.40
codegen_flags: <defaults>
</compile_context>

<pallas_src>
import jax
import jax.numpy as jnp
from jax.experimental import pallas as pl
from jax.experimental.pallas import tpu as pltpu

_LANE = 128
# Per-block VMEM budget. 2 MiB/block * (1 input + 1 output) * double-buffering
# = 8 MiB, safely inside the scoped-VMEM defaults on v5e (16 MiB), v6e (32 MiB)
# and v7x (32 MiB scoped of 64 MiB physical) — no vmem_limit_bytes needed.
_TARGET_BLOCK_BYTES = 2 * 1024 * 1024


def _abs_kernel(x_ref, o_ref):
    # Elementwise absolute value on the whole VMEM tile (pure VPU work).
    o_ref[...] = jnp.abs(x_ref[...])


def _sublane_multiple(dtype) -> int:
    # Minimum sublane alignment for a non-full block row dim per dtype width.
    itemsize = jnp.dtype(dtype).itemsize
    if itemsize >= 4:
        return 8
    if itemsize == 2:
        return 16
    return 32


def _pick_lane_width(n: int):
    """Largest lane-dense width (multiple of 128) that divides n exactly."""
    for lanes in (2048, 1024, 512, 256, 128):
        if n % lanes == 0:
            return lanes
    return None


def _pick_tile_rows(rows: int, cols: int, dtype) -> int:
    """Pick a block row count: multiple of the sublane alignment, ~2 MiB per
    block, preferring an exact divisor of `rows` (no ragged trailing block)."""
    sub = _sublane_multiple(dtype)
    if rows <= sub:
        # Block row dim == full array dim is always legal regardless of
        # alignment.
        return rows
    itemsize = jnp.dtype(dtype).itemsize
    max_by_budget = max(sub, _TARGET_BLOCK_BYTES // (cols * itemsize))
    tr = min((rows // sub) * sub, (max_by_budget // sub) * sub)
    tr = max(tr, sub)
    # Prefer a tile that divides `rows` exactly (pad-free, no masked stores).
    for cand in range(tr, sub - 1, -sub):
        if rows % cand == 0:
            return cand
    return tr  # ragged trailing block handled by the pl.cdiv grid


def _abs_2d(x2: jax.Array, tile_rows: int) -> jax.Array:
    rows, cols = x2.shape
    grid = (pl.cdiv(rows, tile_rows),)
    return pl.pallas_call(
        _abs_kernel,
        out_shape=jax.ShapeDtypeStruct((rows, cols), x2.dtype),
        grid=grid,
        in_specs=[pl.BlockSpec((tile_rows, cols), lambda i: (i, 0))],
        out_specs=pl.BlockSpec((tile_rows, cols), lambda i: (i, 0)),
        compiler_params=pltpu.CompilerParams(
            dimension_semantics=("parallel",)
        ),
    )(x2)


def abs_activation(x: jax.Array) -> jax.Array:
    """Computes |x| with a Pallas TPU kernel. Matches torch.abs semantics for
    real float / integer dtypes: same shape, same dtype, elementwise."""
    if jnp.issubdtype(x.dtype, jnp.complexfloating):
        # TODO(synk): torch.abs(complex) returns a real-dtype magnitude; this
        # elementwise same-dtype kernel does not cover that case.
        raise NotImplementedError("complex inputs are not supported")

    orig_shape = x.shape
    n = x.size
    if n == 0:
        return x

    flat = x.reshape(-1)
    lanes = _pick_lane_width(n)
    if lanes is not None:
        # Pad-free, lane-dense path: (rows, lanes) with lanes a multiple of
        # 128, so every store is a full (unmasked) vst.
        rows = n // lanes
        x2 = flat.reshape(rows, lanes)
        out2 = _abs_2d(x2, _pick_tile_rows(rows, lanes, x.dtype))
        return out2.reshape(orig_shape)

    # Fallback (total size not divisible by 128): pad once in the flat 1-D
    # view, run lane-dense, then trim.
    pad = (-n) % _LANE
    rows = (n + pad) // _LANE
    x2 = jnp.pad(flat, (0, pad)).reshape(rows, _LANE)
    out2 = _abs_2d(x2, _pick_tile_rows(rows, _LANE, x.dtype))
    return out2.reshape(-1)[:n].reshape(orig_shape)


if __name__ == "__main__":
    key = jax.random.PRNGKey(0)

    # Small NCHW input consistent with a conv-network activation.
    x = jax.random.normal(key, (2, 4, 16, 16), dtype=jnp.float32)
    y = jax.block_until_ready(abs_activation(x))
    assert y.shape == x.shape and y.dtype == x.dtype
    assert jnp.allclose(y, jnp.abs(x)), "mismatch with reference abs (f32)"

    # Exercise the non-128-divisible fallback path.
    x_odd = jax.random.normal(key, (3, 5, 7), dtype=jnp.float32)
    y_odd = jax.block_until_ready(abs_activation(x_odd))
    assert y_odd.shape == x_odd.shape and y_odd.dtype == x_odd.dtype
    assert jnp.allclose(y_odd, jnp.abs(x_odd)), "mismatch on fallback path"

    # Exercise a narrower dtype (16-sublane alignment path).
    x_bf16 = jax.random.normal(key, (2, 4, 16, 16), dtype=jnp.bfloat16)
    y_bf16 = jax.block_until_ready(abs_activation(x_bf16))
    assert y_bf16.shape == x_bf16.shape and y_bf16.dtype == x_bf16.dtype
    assert jnp.allclose(y_bf16, jnp.abs(x_bf16)), "mismatch on bf16 path"

    print("KERNEL_OK")
</pallas_src>

<mosaic_0001>
module attributes {stable_mosaic.version = 11 : i64} {
  func.func @_abs_kernel(%arg0: i32, %arg1: memref<1x2048xf32, #tpu.memory_space<vmem>>, %arg2: memref<1x2048xf32, #tpu.memory_space<vmem>>) attributes {dimension_semantics = [#tpu.dimension_semantics<parallel>], iteration_bounds = array<i64: 1>, scalar_prefetch = 0 : i64, scratch_operands = 0 : i64, tpu.core_type = #tpu.core_type<tc>, window_params = [{transform_indices = @transform_0, window_bounds = array<i64: 1, 2048>}, {transform_indices = @transform_1, window_bounds = array<i64: 1, 2048>}]} {
    %c0 = arith.constant 0 : index
    %c0_0 = arith.constant 0 : index
    %0 = vector.load %arg1[%c0, %c0_0] : memref<1x2048xf32, #tpu.memory_space<vmem>>, vector<1x2048xf32>
    %1 = math.absf %0 : vector<1x2048xf32>
    %c0_1 = arith.constant 0 : index
    %c0_2 = arith.constant 0 : index
    %2 = vector.load %arg2[%c0_1, %c0_2] : memref<1x2048xf32, #tpu.memory_space<vmem>>, vector<1x2048xf32>
    tpu.vector_store %arg2[%c0_1, %c0_2], %1 {strides = array<i32>} : memref<1x2048xf32, #tpu.memory_space<vmem>>, vector<1x2048xf32>,
    return
  }
  func.func @transform_0(%arg0: i32) -> (i32, i32) {
    %c0_i32 = arith.constant 0 : i32
    %c0_i32_0 = arith.constant 0 : i32
    return %arg0, %c0_i32 : i32, i32
  }
  func.func @transform_1(%arg0: i32) -> (i32, i32) {
    %c0_i32 = arith.constant 0 : i32
    %c0_i32_0 = arith.constant 0 : i32
    return %arg0, %c0_i32 : i32, i32
  }
}

</mosaic_0001>

<bundles_post_ra>
// kernel: tpu_custom_call.1
= control target key start
LH: loop header
LB: loop body
LE: loop exit
PB: predicated region body
PF: predicated region fallthrough
CT: control target
= control target key end

     0   :  { %6 = vsyncpa [#allocation3], 0  ;;  %s118_s0 = inlined_call_operand.hbm [shape: f32[1,2048], index: 0, kind: input, shape index: {}]   ;;  %s119_s1 = inlined_call_operand.hbm [shape: f32[1,2048], index: 1, kind: output, shape index: {}]  }
   0x1   :  { %7 = vsyncpa [#allocation4], 0  ;;  %s13_s8 = sshll.u32 %s118_s0, 4  ;;  %s100_s9 = smov [#allocation2]   ;;  %s14_s8 = int_to_ptr.hbm [resolvable:$true] %s13_s8 }
   0x2   :  { %s15_s10 = sshll.u32 %s100_s9, 4  ;;  %s16_s10 = int_to_ptr.vmem [resolvable:$true] %s15_s10 }
   0x3   :  { %18 = dma.hbm_to_vmem [thread:$0]  %s14_s8, 256, %s16_s10, [#allocation3]  }
   0x4   :  { %96 = dma.done.wait [#allocation3], 256  }
   0x5   :  { %97 = vsyncadd [#allocation3], 4294967040  ;;  %s101_s11 = smov [#allocation5]   ;;  %s36_s15 = sshll.u32 %s119_s1, 4  ;;  %v23_v0 = vld [vmem:[#allocation2] sm:$0xff]  ;;  %v24_v1 = vld [vmem:[#allocation2 + $0x8] sm:$0xff]  ;;  %s37_s15 = int_to_ptr.hbm [resolvable:$true] %s36_s15 }
   0x6   :  { %s34_s12 = sshll.u32 %s101_s11, 4  ;;  %v25_v2 = vand.u32 2147483647, %v23_v0  ;;  %v26_v3 = vand.u32 2147483647, %v24_v1  ;;  %s35_s12 = int_to_ptr.vmem [resolvable:$true] %s34_s12 }
   0x8   :  { %27 = vst [vmem:[#allocation5] sm:$0xff] %v25_v2 }
   0x9   :  { %28 = vst [vmem:[#allocation5 + $0x8] sm:$0xff] %v26_v3 }
   0xa   :  { %39 = dma.vmem_to_hbm [thread:$0]  %s35_s12, 256, %s37_s15, [#allocation4]  }
   0xb   :  { %98 = dma.done.wait [#allocation4], 256  }
   0xc   :  { %99 = vsyncadd [#allocation4], 4294967040 }
   0xd   :  { %44 = vsyncpa [#allocation3], 1 }
   0xe   :  { %45 = vsyncpa [#allocation4], 1 }

</bundles_post_ra>
